<compile_context>
chip_gen: v7x
topology: tpu7x:2x2x1
jax: 0.10.0
libtpu: 0.0.40
codegen_flags: <defaults>
</compile_context>

<pallas_src>
import jax
import jax.numpy as jnp
from jax.experimental import pallas as pl
from jax.experimental.pallas import tpu as pltpu

BLSTATS_DIM = 27                 # nethack.BLSTATS_SHAPE[0]
HIDDEN = 128
OUT_DIM = HIDDEN + BLSTATS_DIM   # 155 = cat([mlp, norm_bls], -1)
CLIP_LO, CLIP_HI = -5.0, 5.0
_TB_MAX = 2048                   # rows per grid step at large batch


def _elu(x):
    # ELU(alpha=1): x if x > 0 else exp(x) - 1.  exp(min(x, 0)) avoids
    # overflow in the untaken branch of the select.
    return jnp.where(x > 0, x, jnp.exp(jnp.minimum(x, 0.0)) - 1.0)


def blstats_kernel(x_ref, ns_ref, w1_ref, b1_ref, w2_ref, b2_ref, out_ref):
    x = x_ref[...]                                 # (tb, 27)  f32
    ns = ns_ref[...]                               # (1, 27)   f32, bcast rows
    norm = jnp.clip(x * ns, CLIP_LO, CLIP_HI)      # f32 on the VPU

    # Full-f32 matmuls (module parity).  K=27 is padded to the MXU contraction
    # size anyway and the kernel is memory-bound, so f32 here is free.
    h1 = jnp.dot(norm, w1_ref[...], preferred_element_type=jnp.float32)
    h1 = _elu(h1 + b1_ref[...])                    # (tb, 128) f32
    h2 = jnp.dot(h1, w2_ref[...], preferred_element_type=jnp.float32)
    h2 = _elu(h2 + b2_ref[...])                    # (tb, 128) f32

    # Fused concat: lane-dense 128-wide MLP slab, then the 27-wide norm tail.
    out_ref[:, :HIDDEN] = h2
    out_ref[:, HIDDEN:] = norm


def _round_up(x, m):
    return ((x + m - 1) // m) * m


def _choose_tiling(batch):
    """Pick (tile_rows, padded_batch).

    * batch < 16: single grid step on the 8-padded batch (no pipeline
      prologue/epilogue for tiny inputs).
    * otherwise: >= 2 grid steps (keeps both TensorCores busy on v7x) with at
      most _TB_MAX rows per step; the batch is padded up to steps * tile so
      ragged sizes (e.g. B=264) never degenerate into many tiny tiles.
    """
    b8 = _round_up(max(batch, 1), 8)
    if b8 < 16:
        return b8, b8
    steps = max(2, pl.cdiv(b8, _TB_MAX))
    tb = _round_up(pl.cdiv(b8, steps), 8)
    return tb, steps * tb


def blstats_encoder(blstats, norm_stats, w1, b1, w2, b2, *, tb=None):
    B, F = blstats.shape
    assert F == BLSTATS_DIM
    if tb is None:
        tb, b_pad = _choose_tiling(B)
    else:
        assert tb == B or tb % 8 == 0
        b_pad = _round_up(B, tb)

    x = blstats.astype(jnp.float32)
    if b_pad != B:
        # Pad ragged batches up to a whole number of tiles; sliced off below.
        x = jnp.pad(x, ((0, b_pad - B), (0, 0)))

    n_steps = b_pad // tb
    param_bytes = (BLSTATS_DIM * HIDDEN + HIDDEN * HIDDEN
                   + 2 * HIDDEN + BLSTATS_DIM) * 4
    cost = pl.CostEstimate(
        flops=2 * b_pad * (BLSTATS_DIM * HIDDEN + HIDDEN * HIDDEN),
        transcendentals=2 * b_pad * HIDDEN,                 # ELU exp calls
        bytes_accessed=b_pad * (BLSTATS_DIM + OUT_DIM) * 4 + param_bytes,
    )

    out = pl.pallas_call(
        blstats_kernel,
        out_shape=jax.ShapeDtypeStruct((b_pad, OUT_DIM), jnp.float32),
        grid_spec=pltpu.PrefetchScalarGridSpec(
            num_scalar_prefetch=0,
            grid=(n_steps,),
            in_specs=[
                pl.BlockSpec((tb, BLSTATS_DIM), lambda i: (i, 0)),      # blstats
                # Grid-invariant blocks (constant index_map -> fetched once):
                pl.BlockSpec((1, BLSTATS_DIM), lambda i: (0, 0)),       # norm stats
                pl.BlockSpec((BLSTATS_DIM, HIDDEN), lambda i: (0, 0)),  # W1
                pl.BlockSpec((1, HIDDEN), lambda i: (0, 0)),            # b1
                pl.BlockSpec((HIDDEN, HIDDEN), lambda i: (0, 0)),       # W2
                pl.BlockSpec((1, HIDDEN), lambda i: (0, 0)),            # b2
            ],
            out_specs=pl.BlockSpec((tb, OUT_DIM), lambda i: (i, 0)),
        ),
        compiler_params=pltpu.CompilerParams(
            dimension_semantics=("parallel",)),
        cost_estimate=cost,
    )(x, norm_stats, w1, b1, w2, b2)

    if b_pad != B:
        out = out[:B]
    return out


def make_params(key):
    k1, k2, k3, k4 = jax.random.split(key, 4)
    # Deterministic synthetic init (PyTorch-style uniform fan-in bounds).
    bound1 = 1.0 / jnp.sqrt(BLSTATS_DIM)
    bound2 = 1.0 / jnp.sqrt(HIDDEN)
    w1 = jax.random.uniform(k1, (BLSTATS_DIM, HIDDEN), jnp.float32, -bound1, bound1)
    b1 = jax.random.uniform(k2, (1, HIDDEN), jnp.float32, -bound1, bound1)
    w2 = jax.random.uniform(k3, (HIDDEN, HIDDEN), jnp.float32, -bound2, bound2)
    b2 = jax.random.uniform(k4, (1, HIDDEN), jnp.float32, -bound2, bound2)
    norm_stats = jnp.array(
        [1.0 / 79.0, 1.0 / 21, 0.0, 1.0 / 10, 1.0 / 10, 1.0 / 10, 1.0 / 10,
         1.0 / 10, 1.0 / 10, 0.0, 1.0 / 10, 1.0 / 10, 0.0, 1.0 / 1000,
         1.0 / 10, 1.0 / 10, 1.0 / 10, 0.0, 1.0 / 10, 1.0 / 100, 1.0 / 1000,
         1.0, 1.0 / 10, 0.0, 0.0, 0.0, 0.0],
        dtype=jnp.float32).reshape(1, BLSTATS_DIM)
    return norm_stats, w1, b1, w2, b2


def reference(blstats, norm_stats, w1, b1, w2, b2):
    """Pure-JAX reference of the PyTorch module (f32, highest precision)."""
    hi = jax.lax.Precision.HIGHEST
    norm = jnp.clip(blstats * norm_stats, CLIP_LO, CLIP_HI)
    h = _elu(jnp.dot(norm, w1, precision=hi) + b1)
    h = _elu(jnp.dot(h, w2, precision=hi) + b2)
    return jnp.concatenate([h, norm], axis=-1)


if __name__ == "__main__":
    key = jax.random.PRNGKey(0)
    kp, kx = jax.random.split(key)
    norm_stats, w1, b1, w2, b2 = make_params(kp)

    # Tiny (single step), ragged (pad path, 2 steps), mid-size (2 steps).
    for B in (8, 20, 300):
        kb = jax.random.fold_in(kx, B)
        # Synthetic blstats-like integer-ish values (hp, gold, depth, ...).
        blstats = jnp.round(
            jax.random.uniform(kb, (B, BLSTATS_DIM), jnp.float32, 0.0, 200.0))

        out = blstats_encoder(blstats, norm_stats, w1, b1, w2, b2)
        out = jax.block_until_ready(out)
        assert out.shape == (B, OUT_DIM), out.shape

        ref = reference(blstats, norm_stats, w1, b1, w2, b2)
        # Norm tail involves no matmul -> must match (near-)exactly.
        assert jnp.allclose(out[:, HIDDEN:], ref[:, HIDDEN:], atol=1e-6), \
            f"norm tail mismatch at B={B}"
        # MLP slab: tolerance covers whichever MXU f32-matmul pass scheme the
        # backend picks vs the HIGHEST-precision XLA reference.
        assert jnp.allclose(out[:, :HIDDEN], ref[:, :HIDDEN],
                            atol=5e-2, rtol=5e-2), \
            f"mlp slab mismatch at B={B}"

    print("KERNEL_OK")
</pallas_src>

<mosaic_0001>
module attributes {stable_mosaic.version = 11 : i64} {
  func.func @blstats_kernel(%arg0: i32, %arg1: memref<8x27xf32, #tpu.memory_space<vmem>>, %arg2: memref<1x27xf32, #tpu.memory_space<vmem>>, %arg3: memref<27x128xf32, #tpu.memory_space<vmem>>, %arg4: memref<1x128xf32, #tpu.memory_space<vmem>>, %arg5: memref<128x128xf32, #tpu.memory_space<vmem>>, %arg6: memref<1x128xf32, #tpu.memory_space<vmem>>, %arg7: memref<8x155xf32, #tpu.memory_space<vmem>>) attributes {dimension_semantics = [#tpu.dimension_semantics<parallel>], iteration_bounds = array<i64: 1>, scalar_prefetch = 0 : i64, scratch_operands = 0 : i64, tpu.core_type = #tpu.core_type<tc>, window_params = [{transform_indices = @transform_0, window_bounds = array<i64: 8, 27>}, {pipeline_mode = #tpu.pipeline_mode<synchronous>, transform_indices = @transform_1, window_bounds = array<i64: 1, 27>}, {pipeline_mode = #tpu.pipeline_mode<synchronous>, transform_indices = @transform_2, window_bounds = array<i64: 27, 128>}, {pipeline_mode = #tpu.pipeline_mode<synchronous>, transform_indices = @transform_3, window_bounds = array<i64: 1, 128>}, {pipeline_mode = #tpu.pipeline_mode<synchronous>, transform_indices = @transform_4, window_bounds = array<i64: 128, 128>}, {pipeline_mode = #tpu.pipeline_mode<synchronous>, transform_indices = @transform_5, window_bounds = array<i64: 1, 128>}, {transform_indices = @transform_6, window_bounds = array<i64: 8, 155>}]} {
    %c0 = arith.constant 0 : index
    %c0_0 = arith.constant 0 : index
    %0 = vector.load %arg1[%c0, %c0_0] : memref<8x27xf32, #tpu.memory_space<vmem>>, vector<8x27xf32>
    %c0_1 = arith.constant 0 : index
    %c0_2 = arith.constant 0 : index
    %1 = vector.load %arg2[%c0_1, %c0_2] : memref<1x27xf32, #tpu.memory_space<vmem>>, vector<1x27xf32>
    %2 = vector.broadcast %1 : vector<1x27xf32> to vector<8x27xf32>
    %3 = arith.mulf %0, %2 : vector<8x27xf32>
    %cst = arith.constant -5.000000e+00 : f32
    %cst_3 = arith.constant 5.000000e+00 : f32
    %4 = vector.broadcast %cst : f32 to vector<8x27xf32>
    %5 = arith.maximumf %4, %3 : vector<8x27xf32>
    %6 = vector.broadcast %cst_3 : f32 to vector<8x27xf32>
    %7 = arith.minimumf %6, %5 : vector<8x27xf32>
    %c0_4 = arith.constant 0 : index
    %c0_5 = arith.constant 0 : index
    %8 = vector.load %arg3[%c0_4, %c0_5] : memref<27x128xf32, #tpu.memory_space<vmem>>, vector<27x128xf32>
    %cst_6 = arith.constant dense<0.000000e+00> : vector<8x128xf32>
    %9 = tpu.matmul %7, %8, %cst_6 {dimension_numbers = #tpu.dot_dimension_numbers<[1], [0], [0], [1], [0, 0, 1, 1], [], []>} : vector<8x27xf32>, vector<27x128xf32>, vector<8x128xf32> -> vector<8x128xf32>
    %c0_7 = arith.constant 0 : index
    %c0_8 = arith.constant 0 : index
    %10 = vector.load %arg4[%c0_7, %c0_8] : memref<1x128xf32, #tpu.memory_space<vmem>>, vector<1x128xf32>
    %11 = vector.broadcast %10 : vector<1x128xf32> to vector<8x128xf32>
    %12 = arith.addf %9, %11 : vector<8x128xf32>
    %cst_9 = arith.constant 0.000000e+00 : f32
    %13 = vector.broadcast %cst_9 : f32 to vector<8x128xf32>
    %14 = arith.cmpf ogt, %12, %13 : vector<8x128xf32>
    %cst_10 = arith.constant 0.000000e+00 : f32
    %15 = vector.broadcast %cst_10 : f32 to vector<8x128xf32>
    %16 = arith.minimumf %12, %15 : vector<8x128xf32>
    %17 = math.exp %16 : vector<8x128xf32>
    %cst_11 = arith.constant 1.000000e+00 : f32
    %18 = vector.broadcast %cst_11 : f32 to vector<8x128xf32>
    %19 = arith.subf %17, %18 : vector<8x128xf32>
    %20 = arith.select %14, %12, %19 : vector<8x128xi1>, vector<8x128xf32>
    %c0_12 = arith.constant 0 : index
    %c0_13 = arith.constant 0 : index
    %21 = vector.load %arg5[%c0_12, %c0_13] : memref<128x128xf32, #tpu.memory_space<vmem>>, vector<128x128xf32>
    %cst_14 = arith.constant dense<0.000000e+00> : vector<8x128xf32>
    %22 = tpu.matmul %20, %21, %cst_14 {dimension_numbers = #tpu.dot_dimension_numbers<[1], [0], [0], [1], [0, 0, 1, 1], [], []>} : vector<8x128xf32>, vector<128x128xf32>, vector<8x128xf32> -> vector<8x128xf32>
    %c0_15 = arith.constant 0 : index
    %c0_16 = arith.constant 0 : index
    %23 = vector.load %arg6[%c0_15, %c0_16] : memref<1x128xf32, #tpu.memory_space<vmem>>, vector<1x128xf32>
    %24 = vector.broadcast %23 : vector<1x128xf32> to vector<8x128xf32>
    %25 = arith.addf %22, %24 : vector<8x128xf32>
    %cst_17 = arith.constant 0.000000e+00 : f32
    %26 = vector.broadcast %cst_17 : f32 to vector<8x128xf32>
    %27 = arith.cmpf ogt, %25, %26 : vector<8x128xf32>
    %cst_18 = arith.constant 0.000000e+00 : f32
    %28 = vector.broadcast %cst_18 : f32 to vector<8x128xf32>
    %29 = arith.minimumf %25, %28 : vector<8x128xf32>
    %30 = math.exp %29 : vector<8x128xf32>
    %cst_19 = arith.constant 1.000000e+00 : f32
    %31 = vector.broadcast %cst_19 : f32 to vector<8x128xf32>
    %32 = arith.subf %30, %31 : vector<8x128xf32>
    %33 = arith.select %27, %25, %32 : vector<8x128xi1>, vector<8x128xf32>
    %c0_20 = arith.constant 0 : index
    %c0_21 = arith.constant 0 : index
    %34 = vector.load %arg7[%c0_20, %c0_21] : memref<8x155xf32, #tpu.memory_space<vmem>>, vector<8x128xf32>
    tpu.vector_store %arg7[%c0_20, %c0_21], %33 {strides = array<i32>} : memref<8x155xf32, #tpu.memory_space<vmem>>, vector<8x128xf32>,
    %c0_22 = arith.constant 0 : index
    %c128 = arith.constant 128 : index
    %35 = vector.load %arg7[%c0_22, %c128] : memref<8x155xf32, #tpu.memory_space<vmem>>, vector<8x27xf32>
    tpu.vector_store %arg7[%c0_22, %c128], %7 {strides = array<i32>} : memref<8x155xf32, #tpu.memory_space<vmem>>, vector<8x27xf32>,
    return
  }
  func.func @transform_0(%arg0: i32) -> (i32, i32) {
    %c0_i32 = arith.constant 0 : i32
    %c0_i32_0 = arith.constant 0 : i32
    return %arg0, %c0_i32 : i32, i32
  }
  func.func @transform_1(%arg0: i32) -> (i32, i32) {
    %c0_i32 = arith.constant 0 : i32
    %c0_i32_0 = arith.constant 0 : i32
    %c0_i32_1 = arith.constant 0 : i32
    return %c0_i32, %c0_i32_0 : i32, i32
  }
  func.func @transform_2(%arg0: i32) -> (i32, i32) {
    %c0_i32 = arith.constant 0 : i32
    %c0_i32_0 = arith.constant 0 : i32
    %c0_i32_1 = arith.constant 0 : i32
    return %c0_i32, %c0_i32_0 : i32, i32
  }
  func.func @transform_3(%arg0: i32) -> (i32, i32) {
    %c0_i32 = arith.constant 0 : i32
    %c0_i32_0 = arith.constant 0 : i32
    %c0_i32_1 = arith.constant 0 : i32
    return %c0_i32, %c0_i32_0 : i32, i32
  }
  func.func @transform_4(%arg0: i32) -> (i32, i32) {
    %c0_i32 = arith.constant 0 : i32
    %c0_i32_0 = arith.constant 0 : i32
    %c0_i32_1 = arith.constant 0 : i32
    return %c0_i32, %c0_i32_0 : i32, i32
  }
  func.func @transform_5(%arg0: i32) -> (i32, i32) {
    %c0_i32 = arith.constant 0 : i32
    %c0_i32_0 = arith.constant 0 : i32
    %c0_i32_1 = arith.constant 0 : i32
    return %c0_i32, %c0_i32_0 : i32, i32
  }
  func.func @transform_6(%arg0: i32) -> (i32, i32) {
    %c0_i32 = arith.constant 0 : i32
    %c0_i32_0 = arith.constant 0 : i32
    return %arg0, %c0_i32 : i32, i32
  }
}

</mosaic_0001>

<bundles_post_ra>
// kernel: tpu_custom_call.1
= control target key start
LH: loop header
LB: loop body
LE: loop exit
PB: predicated region body
PF: predicated region fallthrough
CT: control target
= control target key end

     0   :  { %11 = vsyncpa [#allocation3], 0  ;;  %s620_s0 = inlined_call_operand.hbm [shape: f32[8,27], index: 0, kind: input, shape index: {}]   ;;  %s621_s1 = inlined_call_operand.vmem [shape: f32[1,27], index: 1, kind: input, shape index: {}]   ;;  %s622_s2 = inlined_call_operand.hbm [shape: f32[27,128], index: 2, kind: input, shape index: {}]   ;;  %s623_s3 = inlined_call_operand.vmem [shape: f32[1,128], index: 3, kind: input, shape index: {}]   ;;  %s624_s4 = inlined_call_operand.hbm [shape: f32[128,128], index: 4, kind: input, shape index: {}]   ;;  %s625_s5 = inlined_call_operand.vmem [shape: f32[1,128], index: 5, kind: input, shape index: {}]   ;;  %s626_s6 = inlined_call_operand.hbm [shape: f32[8,155], index: 6, kind: output, shape index: {}]  }
   0x1   :  { %12 = vsyncpa [#allocation6], 0 }
   0x2   :  { %13 = vsyncpa [#allocation4], 0  ;;  %s501_s21 = smov [#allocation5]   ;;  %s407_s25 = scalar_lea.hbm %s622_s2, 512 }
   0x3   :  { %s31_s22 = sshll.u32 %s501_s21, 4  ;;  %p408_p0 = scmp.ne.s32.totalorder %s622_s2, %s407_s25  ;;  %s32_s22 = int_to_ptr.vmem [resolvable:$true] %s31_s22 }
   0x4   :  { %p411_p1 = scmp.lt.u32.totalorder %s407_s25, %s622_s2 }
   0x6   :  { %p413_p2 = pnand %p411_p1, %p408_p0 }
   0x8   :  { %416 = shalt.err (!%p413_p2)
}
   0x9   :  { %s417_s30 = scalar_lea.vmem %s32_s22, 512  ;;  %p422_p4 = scmp.lt.s32.totalorder %s32_s22, %s32_s22 }
   0xa   :  { %p418_p3 = scmp.ne.s32.totalorder %s32_s22, %s417_s30  ;;  %p423_p5 = scmp.lt.s32.totalorder %s417_s30, %s417_s30 }
   0xc   :  { %p424_p6 = por %p423_p5, %p422_p4 }
   0xe   :  { %p425_p7 = pnand %p424_p6, %p418_p3 }
  0x10   :  { %428 = shalt.err (!%p425_p7)
}
  0x11   :  { %s502_s7 = smov 128   ;;  %s503_s8 = smov 8  }
  0x12   :  { %37 = dma.hbm_to_vmem [thread:$0]  %s622_s2, 512, %s32_s22, [#allocation6], %s502_s7, %s502_s7, %s503_s8  }
  0x13   :  { %s504_s11 = smov [#allocation2]   ;;  %s505_s13 = smov [#allocation7]  }
  0x14   :  { %s20_s12 = sshll.u32 %s504_s11, 4  ;;  %s45_s14 = sshll.u32 %s505_s13, 4  ;;  %s21_s12 = int_to_ptr.vmem [resolvable:$true] %s20_s12  ;;  %s46_s14 = int_to_ptr.vmem [resolvable:$true] %s45_s14 }
  0x15   :  { %s429_s17 = scalar_lea.hbm %s620_s0, 128 }
  0x16   :  { %p430_p8 = scmp.ne.s32.totalorder %s620_s0, %s429_s17  ;;  %p433_p9 = scmp.lt.u32.totalorder %s429_s17, %s620_s0 }
  0x18   :  { %p435_p10 = pnand %p433_p9, %p430_p8 }
  0x1a   :  { %438 = shalt.err (!%p435_p10)
}
  0x1b   :  { %s439_s2 = scalar_lea.vmem %s21_s12, 128  ;;  %p444_p12 = scmp.lt.s32.totalorder %s21_s12, %s21_s12 }
  0x1c   :  { %p440_p11 = scmp.ne.s32.totalorder %s21_s12, %s439_s2  ;;  %p445_p13 = scmp.lt.s32.totalorder %s439_s2, %s439_s2 }
  0x1e   :  { %p446_p0 = por %p445_p13, %p444_p12 }
  0x20   :  { %p447_p1 = pnand %p446_p0, %p440_p11 }
  0x22   :  { %450 = shalt.err (!%p447_p1)
}
  0x23   :  { %23 = dma.hbm_to_vmem [thread:$0]  %s620_s0, 128, %s21_s12, [#allocation3]  }
  0x24   :  { %s451_s26 = scalar_lea.hbm %s624_s4, 2048 }
  0x25   :  { %p452_p2 = scmp.ne.s32.totalorder %s624_s4, %s451_s26  ;;  %p455_p3 = scmp.lt.u32.totalorder %s451_s26, %s624_s4 }
  0x27   :  { %p457_p4 = pnand %p455_p3, %p452_p2 }
  0x29   :  { %460 = shalt.err (!%p457_p4)
}
  0x2a   :  { %s461_s9 = scalar_lea.vmem %s46_s14, 2048  ;;  %p466_p6 = scmp.lt.s32.totalorder %s46_s14, %s46_s14 }
  0x2b   :  { %p462_p5 = scmp.ne.s32.totalorder %s46_s14, %s461_s9  ;;  %p467_p7 = scmp.lt.s32.totalorder %s461_s9, %s461_s9 }
  0x2d   :  { %p468_p8 = por %p467_p7, %p466_p6 }
  0x2f   :  { %p469_p9 = pnand %p468_p8, %p462_p5 }
  0x31   :  { %472 = shalt.err (!%p469_p9)
}
  0x32   :  { %51 = dma.hbm_to_vmem [thread:$0]  %s624_s4, 2048, %s46_s14, [#allocation6], %s502_s7, %s502_s7, %s503_s8  }
  0x33   :  { %495 = dma.done.wait [#allocation3], 128  }
  0x34   :  { %496 = vsyncadd [#allocation3], 4294967168 }
  0x35   :  { %497 = dma.done.wait [#allocation6], 2560  }
  0x36   :  { %498 = vsyncadd [#allocation6], 4294964736  ;;  %v506_v0 = vmov 0.0|0.0   ;;  %vm507_vm0 = vmmov 0   ;;  %v508_v1 = vmov 0.0   ;;  %v74_v2 = vld [vmem:[#allocation5] sm:$0xff] }
  0x37   :  { %362 = vmatprep.subr.bf16.mxu0 %v506_v0  ;;  %369 = vmatprep.subr.bf16.mxu1 %v506_v0  ;;  %v75_v3 = vld [vmem:[#allocation5 + $0x8] sm:$0xff]  ;;  %v76_v4 = vld [vmem:[#allocation5 + $0x10] sm:$0xff]  ;;  %vm89_vm1 = vcmask 1042432   ;;  %v77_v6 = vld [vmem:[#allocation5 + $0x18] sm:$0x7]  ;;  %vm509_vm2 = vmmov 1  }
  0x38   :  { %324 = vmatprep.mubr.msk.f32.mxu0 %vm507_vm0, %v508_v1  ;;  %359 = vmatprep.mubr.msk.f32.mxu1 %vm507_vm0, %v508_v1  ;;  %v363_v5 = vpack.c.bf16 %v75_v3, %v74_v2  ;;  %v63_v7 = vld [vmem:[#allocation2] sm:$0xff]  ;;  %v169_v10 = vld [vmem:[#allocation7] sm:$0xff]  ;;  %v170_v11 = vld [vmem:[#allocation7 + $0x8] sm:$0xff]  ;;  %v366_v13 = vpack.c.bf16 %v77_v6, %v76_v4  ;;  %vm85_vm4 = vcmask 220160  }
  0x39   :  { %v286_v8 = vld [vmem:[%s621_s1] ss:$0 sm:$0xff]  ;;  %v171_v12 = vld [vmem:[#allocation7 + $0x10] sm:$0xff]  ;;  %v370_v14 = vpack.c.bf16 %v170_v11, %v169_v10  ;;  %vm367_vm3 = vmpackc.low %vm89_vm1, %vm509_vm2 }
  0x3a   :  { %v71_v9 = vmul.f32 %v286_v8, %v63_v7  ;;  %364 = vmatpush3.bf16.msra.mxu0 %v363_v5  ;;  %v172_v15 = vld [vmem:[#allocation7 + $0x18] sm:$0xff]  ;;  %v173_v18 = vld [vmem:[#allocation7 + $0x20] sm:$0xff]  ;;  %v174_v19 = vld [vmem:[#allocation7 + $0x28] sm:$0xff] }
  0x3b   :  { %365 = vmatprep.subr.bf16.mxu0 %v506_v0  ;;  %371 = vmatpush3.bf16.msra.mxu1 %v370_v14  ;;  %v373_v17 = vpack.c.bf16 %v172_v15, %v171_v12  ;;  %v376_v20 = vpack.c.bf16 %v174_v19, %v173_v18  ;;  %v175_v21 = vld [vmem:[#allocation7 + $0x30] sm:$0xff]  ;;  %v176_v22 = vld [vmem:[#allocation7 + $0x38] sm:$0xff]  ;;  %v177_v24 = vld [vmem:[#allocation7 + $0x40] sm:$0xff] }
  0x3c   :  { %v287_v16 = vclamps-f32 %v71_v9, 5.0  ;;  %372 = vmatprep.subr.bf16.mxu1 %v506_v0  ;;  %v379_v23 = vpack.c.bf16 %v176_v22, %v175_v21  ;;  %v178_v25 = vld [vmem:[#allocation7 + $0x48] sm:$0xff]  ;;  %v179_v27 = vld [vmem:[#allocation7 + $0x50] sm:$0xff]  ;;  %v180_v28 = vld [vmem:[#allocation7 + $0x58] sm:$0xff] }
  0x3d   :  { %v382_v26 = vpack.c.bf16 %v178_v25, %v177_v24  ;;  %v181_v29 = vld [vmem:[#allocation7 + $0x60] sm:$0xff]  ;;  %v385_v30 = vpack.c.bf16 %v180_v28, %v179_v27  ;;  %v182_v31 = vld [vmem:[#allocation7 + $0x68] sm:$0xff]  ;;  %v183_v33 = vld [vmem:[#allocation7 + $0x70] sm:$0xff] }
  0x3e   :  { %269 = vst.msk [vmem:[#allocation8 + $0x8] sm:$0xff] %vm85_vm4, %v287_v16  ;;  %368 = vmatpush3.bf16.msk.msra.mxu0 %vm367_vm3, %v366_v13  ;;  %v388_v32 = vpack.c.bf16 %v182_v31, %v181_v29  ;;  %v184_v34 = vld [vmem:[#allocation7 + $0x78] sm:$0xff] }
  0x3f   :  { %374 = vmatpush3.bf16.msra.mxu1 %v373_v17  ;;  %v391_v35 = vpack.c.bf16 %v184_v34, %v183_v33  ;;  %v288_v36 = vld [vmem:[%s623_s3] ss:$0 sm:$0xff]  ;;  %s510_s3 = smov [#allocation8]  }
  0x40   :  { %375 = vmatprep.subr.bf16.mxu1 %v506_v0  ;;  %v292_v45 = vld [vmem:[%s625_s5] ss:$0 sm:$0xff]  ;;  %s276_s13 = sshll.u32 %s510_s3, 4  ;;  %s277_s13 = int_to_ptr.vmem [resolvable:$true] %s276_s13 }
  0x41   :  { %325 = vmatmul.mubr.msk.f32.vlgmr.msra.gmra.mrb[0].mxu0 %vm85_vm4, %v287_v16  ;;  %s473_s14 = scalar_lea.vmem %s277_s13, 256  ;;  %p478_p11 = scmp.lt.s32.totalorder %s277_s13, %s277_s13 }
  0x42   :  { %p474_p10 = scmp.ne.s32.totalorder %s277_s13, %s473_s14  ;;  %p479_p12 = scmp.lt.s32.totalorder %s473_s14, %s473_s14 }
  0x43   :  { %377 = vmatpush3.bf16.msra.mxu1 %v376_v20 }
  0x44   :  { %378 = vmatprep.subr.bf16.mxu1 %v506_v0  ;;  %p480_p13 = por %p479_p12, %p478_p11 }
  0x46   :  { %p481_p0 = pnand %p480_p13, %p474_p10 }
  0x47   :  { %380 = vmatpush3.bf16.msra.mxu1 %v379_v23 }
  0x48   :  { %381 = vmatprep.subr.bf16.mxu1 %v506_v0 }
  0x4b   :  { %383 = vmatpush3.bf16.msra.mxu1 %v382_v26 }
  0x4c   :  { %384 = vmatprep.subr.bf16.mxu1 %v506_v0 }
  0x4f   :  { %386 = vmatpush3.bf16.msra.mxu1 %v385_v30 }
  0x50   :  { %387 = vmatprep.subr.bf16.mxu1 %v506_v0 }
  0x53   :  { %389 = vmatpush3.bf16.msra.mxu1 %v388_v32 }
  0x54   :  { %390 = vmatprep.subr.bf16.mxu1 %v506_v0 }
  0x57   :  { %392 = vmatpush3.bf16.msra.mxu1 %v391_v35 }
 0x114   :  { %v159_v37 = vpop.f32.mrb[0].mxu0 }
 0x115   :  { %v160_v38 = vadd.f32 %v288_v36, %v159_v37  ;;  %v326_v39 = vpop.f32.mrb[1].mxu0 }
 0x117   :  { %v164_v40 = vmin.f32 %v160_v38, 0.0  ;;  %vm163_vm5 = vcmp.gt.f32.partialorder %v160_v38, 0.0 }
 0x119   :  { %v165_v41 = vmul.f32 1.442695, %v164_v40 }
 0x11b   :  { %403 = vpow2.f32 %v165_v41 }
 0x125   :  { %v404_v42 = vpop.eup %403 }
 0x126   :  { %v291_v43 = vadd.f32 -1.0, %v404_v42 }
 0x128   :  { %v168_v44 = vsel %vm163_vm5, %v160_v38, %v291_v43 }
 0x129   :  { %360 = vmatmul.mubr.f32.vlgmr.msra.gmra.mrb[0].mxu1 %v168_v44 }
 0x1fc   :  { %v258_v46 = vpop.f32.mrb[0].mxu1 }
 0x1fd   :  { %v259_v47 = vadd.f32 %v292_v45, %v258_v46  ;;  %v361_v48 = vpop.f32.mrb[1].mxu1 }
 0x1ff   :  { %v263_v49 = vmin.f32 %v259_v47, 0.0  ;;  %vm262_vm6 = vcmp.gt.f32.partialorder %v259_v47, 0.0 }
 0x201   :  { %v264_v50 = vmul.f32 1.442695, %v263_v49 }
 0x203   :  { %405 = vpow2.f32 %v264_v50 }
 0x20d   :  { %v406_v51 = vpop.eup %405 }
 0x20e   :  { %v293_v52 = vadd.f32 -1.0, %v406_v51 }
 0x210   :  { %v267_v53 = vsel %vm262_vm6, %v259_v47, %v293_v52 }
 0x211   :  { %268 = vst [vmem:[#allocation8] sm:$0xff] %v267_v53 }
 0x212   :  { %484 = shalt.err (!%p481_p0)
}
 0x213   :  { %s485_s16 = scalar_lea.hbm %s626_s6, 256 }
 0x214   :  { %p486_p1 = scmp.ne.s32.totalorder %s626_s6, %s485_s16  ;;  %p489_p2 = scmp.lt.u32.totalorder %s485_s16, %s626_s6 }
 0x216   :  { %p491_p3 = pnand %p489_p2, %p486_p1 }
 0x218   :  { %494 = shalt.err (!%p491_p3)
}
 0x219   :  { %279 = dma.vmem_to_hbm [thread:$0]  %s277_s13, 256, %s626_s6, [#allocation4]  }
 0x21a   :  { %499 = dma.done.wait [#allocation4], 256  }
 0x21b   :  { %500 = vsyncadd [#allocation4], 4294967040 }
 0x21c   :  { %283 = vsyncpa [#allocation3], 1 }
 0x21d   :  { %284 = vsyncpa [#allocation6], 1 }
 0x21e   :  { %285 = vsyncpa [#allocation4], 1 }

</bundles_post_ra>
